<compile_context>
chip_gen: v5e
topology: v5e:2x2
jax: 0.10.0
libtpu: 0.0.40
codegen_flags: <defaults>
</compile_context>

<pallas_src>
import math

import jax
import jax.numpy as jnp
from jax.experimental import pallas as pl
from jax.experimental.pallas import tpu as pltpu

_MAX_ROWS_PER_BLOCK = 1024   # (2,4,1024,128) f32 = 4 MiB/step input block
_MIN_SPLIT_ROWS = 256        # only force a >=2-step grid when steps stay >= ~512 KiB

_KEEP_DTYPES = (jnp.dtype(jnp.float32), jnp.dtype(jnp.bfloat16))


def _recip(x):
    """Approx EUP reciprocal + one Newton step (~f32 accurate, no VALU divide)."""
    r = pl.reciprocal(x, approx=True)
    return r * (2.0 - x * r)


def _atan(x):
    # Cephes-style float32 arctan built from ops guaranteed to lower in
    # Mosaic (abs / mul / add / where / EUP reciprocal).  |err| ~2e-7.
    # The two branch divides are folded into one reciprocal of a
    # where-selected denominator (denominator is always >= 1).
    # TODO(synk): switch to jnp.arctan once a direct Mosaic lowering is guaranteed.
    pio2 = 1.5707963267948966
    pio4 = 0.7853981633974483
    neg = x < 0.0
    ax = jnp.abs(x)
    big = ax > 2.414213562373095                                   # tan(3*pi/8)
    mid = jnp.logical_and(ax > 0.4142135623730950, jnp.logical_not(big))  # tan(pi/8)
    y0 = jnp.where(big, pio2, jnp.where(mid, pio4, 0.0))
    num = jnp.where(big, -1.0, ax - 1.0)
    den = jnp.where(big, ax, ax + 1.0)          # big => ax>2.41, else ax+1>=1
    z = jnp.where(jnp.logical_or(big, mid), num * _recip(den), ax)
    zz = z * z
    p = (((8.05374449538e-2 * zz - 1.38776856032e-1) * zz
          + 1.99777106478e-1) * zz - 3.33329491539e-1) * zz * z + z
    y = y0 + p
    return jnp.where(neg, -y, y)


def _make_iou_kernel(loss_type):
    """Kernel factory; loss_type is resolved statically at trace time."""

    def kernel(b_ref, o_ref):
        f32 = jnp.float32
        # Dense (r_tile, 128) tiles per coordinate; cast-on-load so bf16
        # inputs only pay half the DMA bytes.
        x1 = b_ref[0, 0].astype(f32); y1 = b_ref[0, 1].astype(f32)
        w1 = b_ref[0, 2].astype(f32); h1 = b_ref[0, 3].astype(f32)
        x2 = b_ref[1, 0].astype(f32); y2 = b_ref[1, 1].astype(f32)
        w2 = b_ref[1, 2].astype(f32); h2 = b_ref[1, 3].astype(f32)

        # --- corner sub-expressions, computed once and shared everywhere ---
        hw1 = 0.5 * w1; hh1 = 0.5 * h1
        hw2 = 0.5 * w2; hh2 = 0.5 * h2
        p_x1 = x1 - hw1; p_x2 = x1 + hw1; p_y1 = y1 - hh1; p_y2 = y1 + hh1
        g_x1 = x2 - hw2; g_x2 = x2 + hw2; g_y1 = y2 - hh2; g_y2 = y2 + hh2

        tl_x = jnp.maximum(p_x1, g_x1); tl_y = jnp.maximum(p_y1, g_y1)
        br_x = jnp.minimum(p_x2, g_x2); br_y = jnp.minimum(p_y2, g_y2)

        if loss_type in ("iou", "giou", "ciou"):
            area_i = jnp.where(jnp.logical_and(tl_x < br_x, tl_y < br_y),
                               (br_x - tl_x) * (br_y - tl_y), 0.0)
            area_u = w1 * h1 + w2 * h2 - area_i
            iou = area_i * _recip(area_u + 1e-16)

        if loss_type == "iou":
            loss = 1.0 - iou * iou

        elif loss_type == "giou":
            c_w = jnp.maximum(p_x2, g_x2) - jnp.minimum(p_x1, g_x1)
            c_h = jnp.maximum(p_y2, g_y2) - jnp.minimum(p_y1, g_y1)
            area_c = c_w * c_h
            giou = iou - (area_c - area_u) * _recip(jnp.maximum(area_c, 1e-16))
            loss = 1.0 - jnp.clip(giou, -1.0, 1.0)

        elif loss_type == "ciou":
            dx = x1 - x2
            dy = y1 - y2
            center_distance = dx * dx + dy * dy
            ew = jnp.maximum(jnp.maximum(p_x2, g_x2) - jnp.minimum(p_x1, g_x1), 0.0)
            eh = jnp.maximum(jnp.maximum(p_y2, g_y2) - jnp.minimum(p_y1, g_y1), 0.0)
            enclose_diag = ew * ew + eh * eh
            ciou = iou - center_distance * _recip(jnp.maximum(enclose_diag, 1e-6))
            da = (_atan(w1 * _recip(jnp.maximum(h1, 1e-6)))
                  - _atan(w2 * _recip(jnp.maximum(h2, 1e-6))))
            v = (4.0 / (math.pi ** 2)) * (da * da)
            alpha = v * _recip(jnp.maximum(1.0 - iou + v, 1e-6))
            ciou = ciou - alpha * v
            loss = 1.0 - jnp.clip(ciou, -1.0, 1.0)

        elif loss_type == "piou":  # piou(..., PIoU=False, PIoU2=True, Lambda=1.3)
            eps = 1e-7
            lam = 1.3
            inter = (jnp.maximum(br_x - tl_x, 0.0)
                     * jnp.maximum(br_y - tl_y, 0.0))
            union = w1 * h1 + w2 * h2 - inter + eps
            iou = inter * _recip(union)
            dw1 = jnp.abs(jnp.minimum(p_x2, p_x1) - jnp.minimum(g_x2, g_x1))
            dw2 = jnp.abs(jnp.maximum(p_x2, p_x1) - jnp.maximum(g_x2, g_x1))
            dh1 = jnp.abs(jnp.minimum(p_y2, p_y1) - jnp.minimum(g_y2, g_y1))
            dh2 = jnp.abs(jnp.maximum(p_y2, p_y1) - jnp.maximum(g_y2, g_y1))
            big_p = ((dw1 + dw2) * _recip(jnp.abs(w2))
                     + (dh1 + dh2) * _recip(jnp.abs(h2))) * 0.25
            l_v1 = 1.0 - iou - jnp.exp(-(big_p * big_p)) + 1.0
            q = jnp.exp(-big_p)
            xq = q * lam
            loss = 3.0 * xq * jnp.exp(-(xq * xq)) * l_v1
        else:
            raise ValueError(f"unknown loss_type {loss_type}")

        o_ref[...] = loss

    return kernel


def _cdiv(a, b):
    return -(-a // b)


def _choose_tiling(n):
    """Pick (rows_per_block, total_rows) for n boxes laid out 128 per lane-row."""
    rows = _cdiv(n, 128)                 # lane rows needed
    rows8 = _cdiv(rows, 8) * 8           # sublane-align
    if rows8 < _MIN_SPLIT_ROWS:
        # Small workload: one grid step.  Splitting on a single-TC chip
        # (v5e/v6e) only adds per-step overhead.
        return rows8, rows8
    # Large workload: >= 2 roughly equal steps (so a v7x megacore can shard
    # the parallel axis), capped at _MAX_ROWS_PER_BLOCK per step.
    steps = max(2, _cdiv(rows8, _MAX_ROWS_PER_BLOCK))
    r_tile = _cdiv(_cdiv(rows8, steps), 8) * 8
    return r_tile, steps * r_tile


def _prep(x):
    x = jnp.reshape(x, (-1, 4))
    if x.dtype not in _KEEP_DTYPES:
        x = x.astype(jnp.float32)
    return x


def _relayout(pred, target, n, rows_total):
    """(n,4) x2 -> (2, 4, rows_total, 128) coord-major; pad lanes = (1,1,1,1) boxes.

    stack + transpose + pad + reshape fuse into one XLA copy fusion (a single
    HBM read + write for both inputs together)."""
    b = jnp.stack([pred, target], axis=0)                      # (2, n, 4)
    b = jnp.transpose(b, (0, 2, 1))                            # (2, 4, n)
    b = jnp.pad(b, ((0, 0), (0, 0), (0, rows_total * 128 - n)),
                constant_values=1.0)
    return b.reshape(2, 4, rows_total, 128)


# rough advisory cost hints per box (flops, transcendental/EUP ops)
_COST_PER_BOX = {"iou": (30, 1), "giou": (45, 3), "ciou": (100, 7), "piou": (80, 6)}


def iou_loss(pred, target, loss_type="ciou", reduction="none"):
    """JAX/Pallas equivalent of IOUloss(reduction, loss_type).forward(pred, target)."""
    assert pred.shape[0] == target.shape[0]
    pred = _prep(pred)
    target = _prep(target)
    if pred.dtype != target.dtype:
        pred = pred.astype(jnp.float32)
        target = target.astype(jnp.float32)
    n = pred.shape[0]

    r_tile, rows_total = _choose_tiling(n)
    grid = rows_total // r_tile

    boxes = _relayout(pred, target, n, rows_total)

    n_pad = rows_total * 128
    flops_per_box, trans_per_box = _COST_PER_BOX[loss_type]
    cost = pl.CostEstimate(
        flops=flops_per_box * n_pad,
        transcendentals=trans_per_box * n_pad,
        bytes_accessed=boxes.size * boxes.dtype.itemsize + n_pad * 4,
    )

    # TODO(synk): on v7x, pltpu.CORE_PARALLEL on this axis guarantees the
    # 2-way TensorCore split; kept as "parallel" here for portability.
    out = pl.pallas_call(
        _make_iou_kernel(loss_type),
        out_shape=jax.ShapeDtypeStruct((rows_total, 128), jnp.float32),
        grid_spec=pltpu.PrefetchScalarGridSpec(
            num_scalar_prefetch=0,
            grid=(grid,),
            in_specs=[
                pl.BlockSpec((2, 4, r_tile, 128), lambda i: (0, 0, i, 0)),
            ],
            out_specs=pl.BlockSpec((r_tile, 128), lambda i: (i, 0)),
        ),
        compiler_params=pltpu.CompilerParams(dimension_semantics=("parallel",)),
        cost_estimate=cost,
    )(boxes)

    loss = out.reshape(-1)[:n]
    if loss_type == "piou":
        loss = loss[:, None]  # torch piou keeps the trailing singleton dim -> (N, 1)
    if reduction == "mean":
        loss = loss.mean()
    elif reduction == "sum":
        loss = loss.sum()
    return loss


# ----------------------- pure-JAX reference (for checking) -----------------------
def _ref_iou_loss(pred, target, loss_type="ciou", reduction="none"):
    pred = jnp.reshape(pred, (-1, 4)).astype(jnp.float32)
    target = jnp.reshape(target, (-1, 4)).astype(jnp.float32)
    tl = jnp.maximum(pred[:, :2] - pred[:, 2:] / 2, target[:, :2] - target[:, 2:] / 2)
    br = jnp.minimum(pred[:, :2] + pred[:, 2:] / 2, target[:, :2] + target[:, 2:] / 2)
    area_p = jnp.prod(pred[:, 2:], 1)
    area_g = jnp.prod(target[:, 2:], 1)
    en = jnp.prod((tl < br).astype(tl.dtype), axis=1)
    area_i = jnp.prod(br - tl, 1) * en
    area_u = area_p + area_g - area_i
    iou = area_i / (area_u + 1e-16)
    if loss_type == "iou":
        loss = 1 - iou ** 2
    elif loss_type == "giou":
        c_tl = jnp.minimum(pred[:, :2] - pred[:, 2:] / 2, target[:, :2] - target[:, 2:] / 2)
        c_br = jnp.maximum(pred[:, :2] + pred[:, 2:] / 2, target[:, :2] + target[:, 2:] / 2)
        area_c = jnp.prod(c_br - c_tl, 1)
        giou = iou - (area_c - area_u) / jnp.maximum(area_c, 1e-16)
        loss = 1 - jnp.clip(giou, -1.0, 1.0)
    elif loss_type == "ciou":
        cd = jnp.sum((pred[:, :2] - target[:, :2]) ** 2, axis=-1)
        e_min = jnp.minimum(pred[:, :2] - pred[:, 2:] / 2, target[:, :2] - target[:, 2:] / 2)
        e_max = jnp.maximum(pred[:, :2] + pred[:, 2:] / 2, target[:, :2] + target[:, 2:] / 2)
        ewh = jnp.maximum(e_max - e_min, 0.0)
        ed = jnp.sum(ewh ** 2, axis=-1)
        ciou = iou - cd / jnp.maximum(ed, 1e-6)
        v = 4 / math.pi ** 2 * (jnp.arctan(pred[:, 2] / jnp.maximum(pred[:, 3], 1e-6))
                                - jnp.arctan(target[:, 2] / jnp.maximum(target[:, 3], 1e-6))) ** 2
        alpha = v / jnp.maximum(1.0 - iou + v, 1e-6)
        ciou = ciou - alpha * v
        loss = 1 - jnp.clip(ciou, -1.0, 1.0)
    elif loss_type == "piou":
        eps, lam = 1e-7, 1.3
        x1, y1, w1, h1 = [pred[:, i:i + 1] for i in range(4)]
        x2, y2, w2, h2 = [target[:, i:i + 1] for i in range(4)]
        w1_, h1_, w2_, h2_ = w1 / 2, h1 / 2, w2 / 2, h2 / 2
        b1x1, b1x2, b1y1, b1y2 = x1 - w1_, x1 + w1_, y1 - h1_, y1 + h1_
        b2x1, b2x2, b2y1, b2y2 = x2 - w2_, x2 + w2_, y2 - h2_, y2 + h2_
        inter = (jnp.clip(jnp.minimum(b1x2, b2x2) - jnp.maximum(b1x1, b2x1), 0)
                 * jnp.clip(jnp.minimum(b1y2, b2y2) - jnp.maximum(b1y1, b2y1), 0))
        union = w1 * h1 + w2 * h2 - inter + eps
        iou = inter / union
        dw1 = jnp.abs(jnp.minimum(b1x2, b1x1) - jnp.minimum(b2x2, b2x1))
        dw2 = jnp.abs(jnp.maximum(b1x2, b1x1) - jnp.maximum(b2x2, b2x1))
        dh1 = jnp.abs(jnp.minimum(b1y2, b1y1) - jnp.minimum(b2y2, b2y1))
        dh2 = jnp.abs(jnp.maximum(b1y2, b1y1) - jnp.maximum(b2y2, b2y1))
        P = ((dw1 + dw2) / jnp.abs(w2) + (dh1 + dh2) / jnp.abs(h2)) / 4
        l_v1 = 1 - iou - jnp.exp(-P ** 2) + 1
        q = jnp.exp(-P)
        xq = q * lam
        loss = 3 * xq * jnp.exp(-xq ** 2) * l_v1
    if reduction == "mean":
        loss = loss.mean()
    elif reduction == "sum":
        loss = loss.sum()
    return loss


def _make_boxes(key, n):
    k1, k2, k3, k4 = jax.random.split(key, 4)
    pred = jnp.concatenate(
        [jax.random.uniform(k1, (n, 2)) * 16.0,
         jax.random.uniform(k2, (n, 2)) * 7.0 + 1.0], axis=-1)
    target = jnp.concatenate(
        [jax.random.uniform(k3, (n, 2)) * 16.0,
         jax.random.uniform(k4, (n, 2)) * 7.0 + 1.0], axis=-1)
    return pred, target


if __name__ == "__main__":
    key = jax.random.PRNGKey(0)
    ka, kb = jax.random.split(key, 2)

    # n=256: e.g. batch=2 x 128 anchors, viewed as (-1, 4) boxes (cx, cy, w, h).
    # n=2176: non-tile-aligned size to exercise lane/sublane padding.
    for seed_key, n in ((ka, 256), (kb, 2176)):
        pred, target = _make_boxes(seed_key, n)

        # Module defaults: reduction='none', loss_type='ciou'
        out = iou_loss(pred, target)
        jax.block_until_ready(out)

        for lt in ("iou", "giou", "ciou", "piou"):
            got = jax.block_until_ready(iou_loss(pred, target, loss_type=lt))
            ref = _ref_iou_loss(pred, target, loss_type=lt)
            assert got.shape == ref.shape, (lt, n, got.shape, ref.shape)
            assert bool(jnp.allclose(got, ref, rtol=1e-4, atol=1e-4)), (lt, n)

        # reduction modes
        got_m = jax.block_until_ready(iou_loss(pred, target, loss_type="ciou",
                                               reduction="mean"))
        ref_m = _ref_iou_loss(pred, target, loss_type="ciou", reduction="mean")
        assert bool(jnp.allclose(got_m, ref_m, rtol=1e-4, atol=1e-4)), ("mean", n)

    print("KERNEL_OK")
</pallas_src>

<mosaic_0001>
module attributes {stable_mosaic.version = 11 : i64} {
  func.func @kernel(%arg0: i32, %arg1: memref<2x4x8x128xf32, #tpu.memory_space<vmem>>, %arg2: memref<8x128xf32, #tpu.memory_space<vmem>>) attributes {dimension_semantics = [#tpu.dimension_semantics<parallel>], iteration_bounds = array<i64: 1>, scalar_prefetch = 0 : i64, scratch_operands = 0 : i64, tpu.core_type = #tpu.core_type<tc>, window_params = [{transform_indices = @transform_0, window_bounds = array<i64: 2, 4, 8, 128>}, {transform_indices = @transform_1, window_bounds = array<i64: 8, 128>}]} {
    %c0 = arith.constant 0 : index
    %c0_0 = arith.constant 0 : index
    %c0_1 = arith.constant 0 : index
    %c0_2 = arith.constant 0 : index
    %0 = vector.load %arg1[%c0, %c0_0, %c0_1, %c0_2] : memref<2x4x8x128xf32, #tpu.memory_space<vmem>>, vector<1x1x8x128xf32>
    %1 = vector.shape_cast %0 : vector<1x1x8x128xf32> to vector<8x128xf32>
    %c0_3 = arith.constant 0 : index
    %c1 = arith.constant 1 : index
    %c0_4 = arith.constant 0 : index
    %c0_5 = arith.constant 0 : index
    %2 = vector.load %arg1[%c0_3, %c1, %c0_4, %c0_5] : memref<2x4x8x128xf32, #tpu.memory_space<vmem>>, vector<1x1x8x128xf32>
    %3 = vector.shape_cast %2 : vector<1x1x8x128xf32> to vector<8x128xf32>
    %c0_6 = arith.constant 0 : index
    %c2 = arith.constant 2 : index
    %c0_7 = arith.constant 0 : index
    %c0_8 = arith.constant 0 : index
    %4 = vector.load %arg1[%c0_6, %c2, %c0_7, %c0_8] : memref<2x4x8x128xf32, #tpu.memory_space<vmem>>, vector<1x1x8x128xf32>
    %5 = vector.shape_cast %4 : vector<1x1x8x128xf32> to vector<8x128xf32>
    %c0_9 = arith.constant 0 : index
    %c3 = arith.constant 3 : index
    %c0_10 = arith.constant 0 : index
    %c0_11 = arith.constant 0 : index
    %6 = vector.load %arg1[%c0_9, %c3, %c0_10, %c0_11] : memref<2x4x8x128xf32, #tpu.memory_space<vmem>>, vector<1x1x8x128xf32>
    %7 = vector.shape_cast %6 : vector<1x1x8x128xf32> to vector<8x128xf32>
    %c1_12 = arith.constant 1 : index
    %c0_13 = arith.constant 0 : index
    %c0_14 = arith.constant 0 : index
    %c0_15 = arith.constant 0 : index
    %8 = vector.load %arg1[%c1_12, %c0_13, %c0_14, %c0_15] : memref<2x4x8x128xf32, #tpu.memory_space<vmem>>, vector<1x1x8x128xf32>
    %9 = vector.shape_cast %8 : vector<1x1x8x128xf32> to vector<8x128xf32>
    %c1_16 = arith.constant 1 : index
    %c1_17 = arith.constant 1 : index
    %c0_18 = arith.constant 0 : index
    %c0_19 = arith.constant 0 : index
    %10 = vector.load %arg1[%c1_16, %c1_17, %c0_18, %c0_19] : memref<2x4x8x128xf32, #tpu.memory_space<vmem>>, vector<1x1x8x128xf32>
    %11 = vector.shape_cast %10 : vector<1x1x8x128xf32> to vector<8x128xf32>
    %c1_20 = arith.constant 1 : index
    %c2_21 = arith.constant 2 : index
    %c0_22 = arith.constant 0 : index
    %c0_23 = arith.constant 0 : index
    %12 = vector.load %arg1[%c1_20, %c2_21, %c0_22, %c0_23] : memref<2x4x8x128xf32, #tpu.memory_space<vmem>>, vector<1x1x8x128xf32>
    %13 = vector.shape_cast %12 : vector<1x1x8x128xf32> to vector<8x128xf32>
    %c1_24 = arith.constant 1 : index
    %c3_25 = arith.constant 3 : index
    %c0_26 = arith.constant 0 : index
    %c0_27 = arith.constant 0 : index
    %14 = vector.load %arg1[%c1_24, %c3_25, %c0_26, %c0_27] : memref<2x4x8x128xf32, #tpu.memory_space<vmem>>, vector<1x1x8x128xf32>
    %15 = vector.shape_cast %14 : vector<1x1x8x128xf32> to vector<8x128xf32>
    %cst = arith.constant 5.000000e-01 : f32
    %16 = vector.broadcast %cst : f32 to vector<8x128xf32>
    %17 = arith.mulf %16, %5 : vector<8x128xf32>
    %cst_28 = arith.constant 5.000000e-01 : f32
    %18 = vector.broadcast %cst_28 : f32 to vector<8x128xf32>
    %19 = arith.mulf %18, %7 : vector<8x128xf32>
    %cst_29 = arith.constant 5.000000e-01 : f32
    %20 = vector.broadcast %cst_29 : f32 to vector<8x128xf32>
    %21 = arith.mulf %20, %13 : vector<8x128xf32>
    %cst_30 = arith.constant 5.000000e-01 : f32
    %22 = vector.broadcast %cst_30 : f32 to vector<8x128xf32>
    %23 = arith.mulf %22, %15 : vector<8x128xf32>
    %24 = arith.subf %1, %17 : vector<8x128xf32>
    %25 = arith.addf %1, %17 : vector<8x128xf32>
    %26 = arith.subf %3, %19 : vector<8x128xf32>
    %27 = arith.addf %3, %19 : vector<8x128xf32>
    %28 = arith.subf %9, %21 : vector<8x128xf32>
    %29 = arith.addf %9, %21 : vector<8x128xf32>
    %30 = arith.subf %11, %23 : vector<8x128xf32>
    %31 = arith.addf %11, %23 : vector<8x128xf32>
    %32 = arith.maximumf %24, %28 : vector<8x128xf32>
    %33 = arith.maximumf %26, %30 : vector<8x128xf32>
    %34 = arith.minimumf %25, %29 : vector<8x128xf32>
    %35 = arith.minimumf %27, %31 : vector<8x128xf32>
    %36 = arith.cmpf olt, %32, %34 : vector<8x128xf32>
    %37 = arith.cmpf olt, %33, %35 : vector<8x128xf32>
    %38 = arith.andi %36, %37 : vector<8x128xi1>
    %39 = arith.subf %34, %32 : vector<8x128xf32>
    %40 = arith.subf %35, %33 : vector<8x128xf32>
    %41 = arith.mulf %39, %40 : vector<8x128xf32>
    %cst_31 = arith.constant 0.000000e+00 : f32
    %42 = vector.broadcast %cst_31 : f32 to vector<8x128xf32>
    %43 = arith.select %38, %41, %42 : vector<8x128xi1>, vector<8x128xf32>
    %44 = arith.mulf %5, %7 : vector<8x128xf32>
    %45 = arith.mulf %13, %15 : vector<8x128xf32>
    %46 = arith.addf %44, %45 : vector<8x128xf32>
    %47 = arith.subf %46, %43 : vector<8x128xf32>
    %cst_32 = arith.constant 1.000000e-16 : f32
    %48 = vector.broadcast %cst_32 : f32 to vector<8x128xf32>
    %49 = arith.addf %47, %48 : vector<8x128xf32>
    %50 = tpu.reciprocal %49 {approx = true} : vector<8x128xf32> -> vector<8x128xf32>
    %51 = arith.mulf %49, %50 : vector<8x128xf32>
    %cst_33 = arith.constant 2.000000e+00 : f32
    %52 = vector.broadcast %cst_33 : f32 to vector<8x128xf32>
    %53 = arith.subf %52, %51 : vector<8x128xf32>
    %54 = arith.mulf %50, %53 : vector<8x128xf32>
    %55 = arith.mulf %43, %54 : vector<8x128xf32>
    %56 = arith.subf %1, %9 : vector<8x128xf32>
    %57 = arith.subf %3, %11 : vector<8x128xf32>
    %58 = arith.mulf %56, %56 : vector<8x128xf32>
    %59 = arith.mulf %57, %57 : vector<8x128xf32>
    %60 = arith.addf %58, %59 : vector<8x128xf32>
    %61 = arith.maximumf %25, %29 : vector<8x128xf32>
    %62 = arith.minimumf %24, %28 : vector<8x128xf32>
    %63 = arith.subf %61, %62 : vector<8x128xf32>
    %cst_34 = arith.constant 0.000000e+00 : f32
    %64 = vector.broadcast %cst_34 : f32 to vector<8x128xf32>
    %65 = arith.maximumf %63, %64 : vector<8x128xf32>
    %66 = arith.maximumf %27, %31 : vector<8x128xf32>
    %67 = arith.minimumf %26, %30 : vector<8x128xf32>
    %68 = arith.subf %66, %67 : vector<8x128xf32>
    %cst_35 = arith.constant 0.000000e+00 : f32
    %69 = vector.broadcast %cst_35 : f32 to vector<8x128xf32>
    %70 = arith.maximumf %68, %69 : vector<8x128xf32>
    %71 = arith.mulf %65, %65 : vector<8x128xf32>
    %72 = arith.mulf %70, %70 : vector<8x128xf32>
    %73 = arith.addf %71, %72 : vector<8x128xf32>
    %cst_36 = arith.constant 9.99999997E-7 : f32
    %74 = vector.broadcast %cst_36 : f32 to vector<8x128xf32>
    %75 = arith.maximumf %73, %74 : vector<8x128xf32>
    %76 = tpu.reciprocal %75 {approx = true} : vector<8x128xf32> -> vector<8x128xf32>
    %77 = arith.mulf %75, %76 : vector<8x128xf32>
    %cst_37 = arith.constant 2.000000e+00 : f32
    %78 = vector.broadcast %cst_37 : f32 to vector<8x128xf32>
    %79 = arith.subf %78, %77 : vector<8x128xf32>
    %80 = arith.mulf %76, %79 : vector<8x128xf32>
    %81 = arith.mulf %60, %80 : vector<8x128xf32>
    %82 = arith.subf %55, %81 : vector<8x128xf32>
    %cst_38 = arith.constant 9.99999997E-7 : f32
    %83 = vector.broadcast %cst_38 : f32 to vector<8x128xf32>
    %84 = arith.maximumf %7, %83 : vector<8x128xf32>
    %85 = tpu.reciprocal %84 {approx = true} : vector<8x128xf32> -> vector<8x128xf32>
    %86 = arith.mulf %84, %85 : vector<8x128xf32>
    %cst_39 = arith.constant 2.000000e+00 : f32
    %87 = vector.broadcast %cst_39 : f32 to vector<8x128xf32>
    %88 = arith.subf %87, %86 : vector<8x128xf32>
    %89 = arith.mulf %85, %88 : vector<8x128xf32>
    %90 = arith.mulf %5, %89 : vector<8x128xf32>
    %cst_40 = arith.constant 0.000000e+00 : f32
    %91 = vector.broadcast %cst_40 : f32 to vector<8x128xf32>
    %92 = arith.cmpf olt, %90, %91 : vector<8x128xf32>
    %93 = math.absf %90 : vector<8x128xf32>
    %cst_41 = arith.constant 2.41421366 : f32
    %94 = vector.broadcast %cst_41 : f32 to vector<8x128xf32>
    %95 = arith.cmpf ogt, %93, %94 : vector<8x128xf32>
    %cst_42 = arith.constant 0.414213568 : f32
    %96 = vector.broadcast %cst_42 : f32 to vector<8x128xf32>
    %97 = arith.cmpf ogt, %93, %96 : vector<8x128xf32>
    %cst_43 = arith.constant dense<true> : vector<8x128xi1>
    %98 = arith.xori %95, %cst_43 : vector<8x128xi1>
    %99 = arith.andi %97, %98 : vector<8x128xi1>
    %cst_44 = arith.constant 0.785398185 : f32
    %cst_45 = arith.constant 0.000000e+00 : f32
    %100 = vector.broadcast %cst_44 : f32 to vector<8x128xf32>
    %101 = vector.broadcast %cst_45 : f32 to vector<8x128xf32>
    %102 = arith.select %99, %100, %101 : vector<8x128xi1>, vector<8x128xf32>
    %cst_46 = arith.constant 1.57079637 : f32
    %103 = vector.broadcast %cst_46 : f32 to vector<8x128xf32>
    %104 = arith.select %95, %103, %102 : vector<8x128xi1>, vector<8x128xf32>
    %cst_47 = arith.constant 1.000000e+00 : f32
    %105 = vector.broadcast %cst_47 : f32 to vector<8x128xf32>
    %106 = arith.subf %93, %105 : vector<8x128xf32>
    %cst_48 = arith.constant -1.000000e+00 : f32
    %107 = vector.broadcast %cst_48 : f32 to vector<8x128xf32>
    %108 = arith.select %95, %107, %106 : vector<8x128xi1>, vector<8x128xf32>
    %cst_49 = arith.constant 1.000000e+00 : f32
    %109 = vector.broadcast %cst_49 : f32 to vector<8x128xf32>
    %110 = arith.addf %93, %109 : vector<8x128xf32>
    %111 = arith.select %95, %93, %110 : vector<8x128xi1>, vector<8x128xf32>
    %112 = arith.ori %95, %99 : vector<8x128xi1>
    %113 = tpu.reciprocal %111 {approx = true} : vector<8x128xf32> -> vector<8x128xf32>
    %114 = arith.mulf %111, %113 : vector<8x128xf32>
    %cst_50 = arith.constant 2.000000e+00 : f32
    %115 = vector.broadcast %cst_50 : f32 to vector<8x128xf32>
    %116 = arith.subf %115, %114 : vector<8x128xf32>
    %117 = arith.mulf %113, %116 : vector<8x128xf32>
    %118 = arith.mulf %108, %117 : vector<8x128xf32>
    %119 = arith.select %112, %118, %93 : vector<8x128xi1>, vector<8x128xf32>
    %120 = arith.mulf %119, %119 : vector<8x128xf32>
    %cst_51 = arith.constant 0.0805374458 : f32
    %121 = vector.broadcast %cst_51 : f32 to vector<8x128xf32>
    %122 = arith.mulf %121, %120 : vector<8x128xf32>
    %cst_52 = arith.constant 0.138776854 : f32
    %123 = vector.broadcast %cst_52 : f32 to vector<8x128xf32>
    %124 = arith.subf %122, %123 : vector<8x128xf32>
    %125 = arith.mulf %124, %120 : vector<8x128xf32>
    %cst_53 = arith.constant 0.199777111 : f32
    %126 = vector.broadcast %cst_53 : f32 to vector<8x128xf32>
    %127 = arith.addf %125, %126 : vector<8x128xf32>
    %128 = arith.mulf %127, %120 : vector<8x128xf32>
    %cst_54 = arith.constant 0.333329499 : f32
    %129 = vector.broadcast %cst_54 : f32 to vector<8x128xf32>
    %130 = arith.subf %128, %129 : vector<8x128xf32>
    %131 = arith.mulf %130, %120 : vector<8x128xf32>
    %132 = arith.mulf %131, %119 : vector<8x128xf32>
    %133 = arith.addf %132, %119 : vector<8x128xf32>
    %134 = arith.addf %104, %133 : vector<8x128xf32>
    %cst_55 = arith.constant 0.000000e+00 : f32
    %135 = vector.broadcast %cst_55 : f32 to vector<8x128xf32>
    %136 = arith.subf %135, %134 : vector<8x128xf32>
    %137 = arith.select %92, %136, %134 : vector<8x128xi1>, vector<8x128xf32>
    %cst_56 = arith.constant 9.99999997E-7 : f32
    %138 = vector.broadcast %cst_56 : f32 to vector<8x128xf32>
    %139 = arith.maximumf %15, %138 : vector<8x128xf32>
    %140 = tpu.reciprocal %139 {approx = true} : vector<8x128xf32> -> vector<8x128xf32>
    %141 = arith.mulf %139, %140 : vector<8x128xf32>
    %cst_57 = arith.constant 2.000000e+00 : f32
    %142 = vector.broadcast %cst_57 : f32 to vector<8x128xf32>
    %143 = arith.subf %142, %141 : vector<8x128xf32>
    %144 = arith.mulf %140, %143 : vector<8x128xf32>
    %145 = arith.mulf %13, %144 : vector<8x128xf32>
    %cst_58 = arith.constant 0.000000e+00 : f32
    %146 = vector.broadcast %cst_58 : f32 to vector<8x128xf32>
    %147 = arith.cmpf olt, %145, %146 : vector<8x128xf32>
    %148 = math.absf %145 : vector<8x128xf32>
    %cst_59 = arith.constant 2.41421366 : f32
    %149 = vector.broadcast %cst_59 : f32 to vector<8x128xf32>
    %150 = arith.cmpf ogt, %148, %149 : vector<8x128xf32>
    %cst_60 = arith.constant 0.414213568 : f32
    %151 = vector.broadcast %cst_60 : f32 to vector<8x128xf32>
    %152 = arith.cmpf ogt, %148, %151 : vector<8x128xf32>
    %cst_61 = arith.constant dense<true> : vector<8x128xi1>
    %153 = arith.xori %150, %cst_61 : vector<8x128xi1>
    %154 = arith.andi %152, %153 : vector<8x128xi1>
    %cst_62 = arith.constant 0.785398185 : f32
    %cst_63 = arith.constant 0.000000e+00 : f32
    %155 = vector.broadcast %cst_62 : f32 to vector<8x128xf32>
    %156 = vector.broadcast %cst_63 : f32 to vector<8x128xf32>
    %157 = arith.select %154, %155, %156 : vector<8x128xi1>, vector<8x128xf32>
    %cst_64 = arith.constant 1.57079637 : f32
    %158 = vector.broadcast %cst_64 : f32 to vector<8x128xf32>
    %159 = arith.select %150, %158, %157 : vector<8x128xi1>, vector<8x128xf32>
    %cst_65 = arith.constant 1.000000e+00 : f32
    %160 = vector.broadcast %cst_65 : f32 to vector<8x128xf32>
    %161 = arith.subf %148, %160 : vector<8x128xf32>
    %cst_66 = arith.constant -1.000000e+00 : f32
    %162 = vector.broadcast %cst_66 : f32 to vector<8x128xf32>
    %163 = arith.select %150, %162, %161 : vector<8x128xi1>, vector<8x128xf32>
    %cst_67 = arith.constant 1.000000e+00 : f32
    %164 = vector.broadcast %cst_67 : f32 to vector<8x128xf32>
    %165 = arith.addf %148, %164 : vector<8x128xf32>
    %166 = arith.select %150, %148, %165 : vector<8x128xi1>, vector<8x128xf32>
    %167 = arith.ori %150, %154 : vector<8x128xi1>
    %168 = tpu.reciprocal %166 {approx = true} : vector<8x128xf32> -> vector<8x128xf32>
    %169 = arith.mulf %166, %168 : vector<8x128xf32>
    %cst_68 = arith.constant 2.000000e+00 : f32
    %170 = vector.broadcast %cst_68 : f32 to vector<8x128xf32>
    %171 = arith.subf %170, %169 : vector<8x128xf32>
    %172 = arith.mulf %168, %171 : vector<8x128xf32>
    %173 = arith.mulf %163, %172 : vector<8x128xf32>
    %174 = arith.select %167, %173, %148 : vector<8x128xi1>, vector<8x128xf32>
    %175 = arith.mulf %174, %174 : vector<8x128xf32>
    %cst_69 = arith.constant 0.0805374458 : f32
    %176 = vector.broadcast %cst_69 : f32 to vector<8x128xf32>
    %177 = arith.mulf %176, %175 : vector<8x128xf32>
    %cst_70 = arith.constant 0.138776854 : f32
    %178 = vector.broadcast %cst_70 : f32 to vector<8x128xf32>
    %179 = arith.subf %177, %178 : vector<8x128xf32>
    %180 = arith.mulf %179, %175 : vector<8x128xf32>
    %cst_71 = arith.constant 0.199777111 : f32
    %181 = vector.broadcast %cst_71 : f32 to vector<8x128xf32>
    %182 = arith.addf %180, %181 : vector<8x128xf32>
    %183 = arith.mulf %182, %175 : vector<8x128xf32>
    %cst_72 = arith.constant 0.333329499 : f32
    %184 = vector.broadcast %cst_72 : f32 to vector<8x128xf32>
    %185 = arith.subf %183, %184 : vector<8x128xf32>
    %186 = arith.mulf %185, %175 : vector<8x128xf32>
    %187 = arith.mulf %186, %174 : vector<8x128xf32>
    %188 = arith.addf %187, %174 : vector<8x128xf32>
    %189 = arith.addf %159, %188 : vector<8x128xf32>
    %cst_73 = arith.constant 0.000000e+00 : f32
    %190 = vector.broadcast %cst_73 : f32 to vector<8x128xf32>
    %191 = arith.subf %190, %189 : vector<8x128xf32>
    %192 = arith.select %147, %191, %189 : vector<8x128xi1>, vector<8x128xf32>
    %193 = arith.subf %137, %192 : vector<8x128xf32>
    %194 = arith.mulf %193, %193 : vector<8x128xf32>
    %cst_74 = arith.constant 0.405284733 : f32
    %195 = vector.broadcast %cst_74 : f32 to vector<8x128xf32>
    %196 = arith.mulf %195, %194 : vector<8x128xf32>
    %cst_75 = arith.constant 1.000000e+00 : f32
    %197 = vector.broadcast %cst_75 : f32 to vector<8x128xf32>
    %198 = arith.subf %197, %55 : vector<8x128xf32>
    %199 = arith.addf %198, %196 : vector<8x128xf32>
    %cst_76 = arith.constant 9.99999997E-7 : f32
    %200 = vector.broadcast %cst_76 : f32 to vector<8x128xf32>
    %201 = arith.maximumf %199, %200 : vector<8x128xf32>
    %202 = tpu.reciprocal %201 {approx = true} : vector<8x128xf32> -> vector<8x128xf32>
    %203 = arith.mulf %201, %202 : vector<8x128xf32>
    %cst_77 = arith.constant 2.000000e+00 : f32
    %204 = vector.broadcast %cst_77 : f32 to vector<8x128xf32>
    %205 = arith.subf %204, %203 : vector<8x128xf32>
    %206 = arith.mulf %202, %205 : vector<8x128xf32>
    %207 = arith.mulf %196, %206 : vector<8x128xf32>
    %208 = arith.mulf %207, %196 : vector<8x128xf32>
    %209 = arith.subf %82, %208 : vector<8x128xf32>
    %cst_78 = arith.constant -1.000000e+00 : f32
    %cst_79 = arith.constant 1.000000e+00 : f32
    %210 = vector.broadcast %cst_78 : f32 to vector<8x128xf32>
    %211 = arith.maximumf %210, %209 : vector<8x128xf32>
    %212 = vector.broadcast %cst_79 : f32 to vector<8x128xf32>
    %213 = arith.minimumf %212, %211 : vector<8x128xf32>
    %cst_80 = arith.constant 1.000000e+00 : f32
    %214 = vector.broadcast %cst_80 : f32 to vector<8x128xf32>
    %215 = arith.subf %214, %213 : vector<8x128xf32>
    %c0_81 = arith.constant 0 : index
    %c0_82 = arith.constant 0 : index
    %216 = vector.load %arg2[%c0_81, %c0_82] : memref<8x128xf32, #tpu.memory_space<vmem>>, vector<8x128xf32>
    tpu.vector_store %arg2[%c0_81, %c0_82], %215 {strides = array<i32>} : memref<8x128xf32, #tpu.memory_space<vmem>>, vector<8x128xf32>,
    return
  }
  func.func @transform_0(%arg0: i32) -> (i32, i32, i32, i32) {
    %c0_i32 = arith.constant 0 : i32
    %c0_i32_0 = arith.constant 0 : i32
    %c0_i32_1 = arith.constant 0 : i32
    %c0_i32_2 = arith.constant 0 : i32
    return %c0_i32, %c0_i32_0, %arg0, %c0_i32_1 : i32, i32, i32, i32
  }
  func.func @transform_1(%arg0: i32) -> (i32, i32) {
    %c0_i32 = arith.constant 0 : i32
    %c0_i32_0 = arith.constant 0 : i32
    return %arg0, %c0_i32 : i32, i32
  }
}

</mosaic_0001>

<bundles_post_ra>
// kernel: tpu_custom_call.1
= control target key start
LH: loop header
LB: loop body
LE: loop exit
PB: predicated region body
PF: predicated region fallthrough
CT: control target
= control target key end

     0   :  { %6 = vsyncpa [#allocation3], 0  ;;  %s423_s0 = inlined_call_operand.hbm [shape: f32[2,4,8,128], index: 0, kind: input, shape index: {}]   ;;  %s424_s1 = inlined_call_operand.hbm [shape: f32[8,128], index: 1, kind: output, shape index: {}]  }
   0x1   :  { %7 = vsyncpa [#allocation4], 0  ;;  %s12_s8 = sshll.u32 %s423_s0, 4  ;;  %s285_s9 = smov [#allocation2]   ;;  %s13_s8 = int_to_ptr.hbm [resolvable:$true] %s12_s8 }
   0x2   :  { %s14_s10 = sshll.u32 %s285_s9, 4  ;;  %s286_s11 = smov 128   ;;  %s15_s10 = int_to_ptr.vmem [resolvable:$true] %s14_s10 }
   0x3   :  { %s287_s12 = smov 8  }
   0x4   :  { %20 = dma.hbm_to_vmem [thread:$0]  %s13_s8, 1024, %s15_s10, [#allocation3], %s286_s11, %s286_s11, %s287_s12  }
   0x5   :  { %281 = dma.done.wait [#allocation3], 1024  }
   0x6   :  { %282 = vsyncadd [#allocation3], 4294966272  ;;  %v31_v0 = vld [vmem:[#allocation2 + $0x18] sm:$0xff]  ;;  %v29_v7 = vld [vmem:[#allocation2 + $0x10] sm:$0xff]  ;;  %vm288_vm5 = vmmov 1   ;;  %s290_s0 = smov [#allocation5]  }
   0x7   :  { %v96_v1 = vmax.f32 %v31_v0, 1e-06  ;;  %v39_v2 = vld [vmem:[#allocation2 + $0x38] sm:$0xff]  ;;  %v37_v9 = vld [vmem:[#allocation2 + $0x30] sm:$0xff]  ;;  %v40_v10 = vmul.f32 0.5, %v29_v7  ;;  %v304_v12 = vld [vmem:[#allocation2] sm:$0xff]  ;;  %v63_v45 = vmul.f32 %v31_v0, %v29_v7 }
   0x8   :  { %v134_v3 = vmax.f32 %v39_v2, 1e-06  ;;  %v41_v13 = vmul.f32 0.5, %v31_v0  ;;  %v42_v14 = vmul.f32 0.5, %v37_v9  ;;  %v306_v16 = vld [vmem:[#allocation2 + $0x8] sm:$0xff]  ;;  %v308_v17 = vld [vmem:[#allocation2 + $0x20] sm:$0xff]  ;;  %v64_v46 = vmul.f32 %v39_v2, %v37_v9 }
   0x9   :  { %219 = vrcp.f32 %v96_v1  ;;  %v43_v18 = vmul.f32 0.5, %v39_v2  ;;  %v310_v20 = vld [vmem:[#allocation2 + $0x28] sm:$0xff]  ;;  %v315_v22 = vsub.f32 %v304_v12, %v40_v10  ;;  %v318_v23 = vadd.f32 %v40_v10, %v304_v12  ;;  %s194_s13 = sshll.u32 %s290_s0, 4  ;;  %s196_s16 = sshll.u32 %s424_s1, 4  ;;  %s195_s13 = int_to_ptr.vmem [resolvable:$true] %s194_s13  ;;  %s197_s16 = int_to_ptr.hbm [resolvable:$true] %s196_s16 }
   0xa   :  { %221 = vrcp.f32 %v134_v3  ;;  %v321_v25 = vsub.f32 %v306_v16, %v41_v13  ;;  %v324_v26 = vadd.f32 %v41_v13, %v306_v16  ;;  %v327_v27 = vsub.f32 %v308_v17, %v42_v14 }
   0xb   :  { %v333_v29 = vadd.f32 %v42_v14, %v308_v17  ;;  %v336_v30 = vsub.f32 %v310_v20, %v43_v18  ;;  %v339_v31 = vadd.f32 %v43_v18, %v310_v20  ;;  %v65_v53 = vadd.f32 %v64_v46, %v63_v45 }
   0xc   :  { %v52_v35 = vmax.f32 %v315_v22, %v327_v27 }
   0xd   :  { %v53_v36 = vmax.f32 %v321_v25, %v336_v30  ;;  %v54_v37 = vmin.f32 %v318_v23, %v333_v29  ;;  %v55_v38 = vmin.f32 %v324_v26, %v339_v31 }
   0xf   :  { %v220_v4 = vpop.eup %219  ;;  %v59_v41 = vsub.f32 %v54_v37, %v52_v35  ;;  %v60_v42 = vsub.f32 %v55_v38, %v53_v36  ;;  %vm56_vm2 = vcmp.lt.f32.partialorder %v52_v35, %v54_v37  ;;  %vm57_vm3 = vcmp.lt.f32.partialorder %v53_v36, %v55_v38 }
  0x10   :  { %v98_v5 = vmul.f32 %v220_v4, %v96_v1  ;;  %v222_v6 = vpop.eup %221  ;;  %vm58_vm7 = vmand %vm56_vm2, %vm57_vm3  ;;  %v289_v36 = vmov 0.0  }
  0x11   :  { %v136_v11 = vmul.f32 %v222_v6, %v134_v3  ;;  %v61_v48 = vmul.f32 %v60_v42, %v59_v41 }
  0x12   :  { %v99_v8 = vsub.f32 2.0, %v98_v5  ;;  %v78_v5 = vmax.f32 %v318_v23, %v333_v29 }
  0x13   :  { %v137_v19 = vsub.f32 2.0, %v136_v11  ;;  %v378_v56 = vsel %vm58_vm7, %v61_v48, 0.0 }
  0x14   :  { %v100_v15 = vmul.f32 %v220_v4, %v99_v8  ;;  %v66_v62 = vsub.f32 %v65_v53, %v378_v56  ;;  %v82_v8 = vmax.f32 %v324_v26, %v339_v31 }
  0x15   :  { %v138_v24 = vmul.f32 %v222_v6, %v137_v19 }
  0x16   :  { %v312_v21 = vmul.f32 %v100_v15, %v29_v7  ;;  %v67_v4 = vadd.f32 1e-16, %v66_v62  ;;  %v79_v7 = vmin.f32 %v315_v22, %v327_v27 }
  0x17   :  { %v341_v32 = vmul.f32 %v138_v24, %v37_v9  ;;  %v83_v9 = vmin.f32 %v321_v25, %v336_v30 }
  0x18   :  { %v330_v28 = vand.u32 2147483647, %v312_v21  ;;  %v80_v18 = vsub.f32 %v78_v5, %v79_v7  ;;  %vm102_vm14 = vcmp.lt.f32.partialorder %v312_v21, 0.0  ;;  %v74_v21 = vsub.f32 %v306_v16, %v310_v20 }
  0x19   :  { %v346_v34 = vand.u32 2147483647, %v341_v32  ;;  %v84_v19 = vsub.f32 %v82_v8, %v83_v9  ;;  %vm140_vm15 = vcmp.lt.f32.partialorder %v341_v32, 0.0 }
  0x1a   :  { %vm104_vm0 = vcmp.gt.f32.partialorder %v330_v28, 2.4142137  ;;  %v112_v33 = vadd.f32 1.0, %v330_v28  ;;  %vm105_vm4 = vcmp.gt.f32.partialorder %v330_v28, 0.41421357  ;;  %v206_v47 = vadd.f32 -1.0, %v330_v28 }
  0x1b   :  { %vm142_vm1 = vcmp.gt.f32.partialorder %v346_v34, 2.4142137  ;;  %v150_v40 = vadd.f32 1.0, %v346_v34  ;;  %vm106_vm6 = vmxor %vm104_vm0, %vm288_vm5  ;;  %vm143_vm9 = vcmp.gt.f32.partialorder %v346_v34, 0.41421357  ;;  %v209_v55 = vadd.f32 -1.0, %v346_v34 }
  0x1c   :  { %v113_v39 = vsel %vm104_vm0, %v330_v28, %v112_v33  ;;  %vm368_vm8 = vmand %vm105_vm4, %vm106_vm6  ;;  %v111_v54 = vsel %vm104_vm0, -1.0, %v206_v47  ;;  %v81_v22 = vmax.f32 %v80_v18, 0.0  ;;  %v85_v27 = vmax.f32 %v84_v19, 0.0 }
  0x1d   :  { %223 = vrcp.f32 %v113_v39  ;;  %v151_v43 = vsel %vm142_vm1, %v346_v34, %v150_v40  ;;  %vm144_vm10 = vmxor %vm142_vm1, %vm288_vm5  ;;  %v149_v63 = vsel %vm142_vm1, -1.0, %v209_v55  ;;  %v108_v25 = vsel %vm368_vm8, 0.7853982, %v289_v36 }
  0x1e   :  { %225 = vrcp.f32 %v151_v43  ;;  %vm114_vm11 = vmor %vm104_vm0, %vm368_vm8  ;;  %v87_v40 = vmul.f32 %v85_v27, %v85_v27  ;;  %v76_v5 = vmul.f32 %v74_v21, %v74_v21 }
  0x1f   :  { %vm384_vm12 = vmand %vm143_vm9, %vm144_vm10  ;;  %227 = vrcp.f32 %v67_v4 }
  0x20   :  { %vm152_vm13 = vmor %vm142_vm1, %vm384_vm12  ;;  %v146_v45 = vsel %vm384_vm12, 0.7853982, %v289_v36 }
  0x23   :  { %v224_v44 = vpop.eup %223 }
  0x24   :  { %v116_v49 = vmul.f32 %v224_v44, %v113_v39  ;;  %v226_v52 = vpop.eup %225  ;;  %v86_v39 = vmul.f32 %v81_v22, %v81_v22 }
  0x25   :  { %v154_v58 = vmul.f32 %v226_v52, %v151_v43  ;;  %v228_v35 = vpop.eup %227  ;;  %v109_v43 = vsel %vm104_vm0, 1.5707964, %v108_v25 }
  0x26   :  { %v117_v51 = vsub.f32 2.0, %v116_v49  ;;  %v69_v38 = vmul.f32 %v228_v35, %v67_v4  ;;  %v88_v48 = vadd.f32 %v87_v40, %v86_v39 }
  0x27   :  { %v155_v61 = vsub.f32 2.0, %v154_v58 }
  0x28   :  { %v118_v57 = vmul.f32 %v224_v44, %v117_v51  ;;  %v70_v47 = vsub.f32 2.0, %v69_v38  ;;  %v147_v51 = vsel %vm142_vm1, 1.5707964, %v146_v45  ;;  %v89_v55 = vmax.f32 %v88_v48, 1e-06 }
  0x29   :  { %v156_v1 = vmul.f32 %v226_v52, %v155_v61 }
  0x2a   :  { %v119_v59 = vmul.f32 %v118_v57, %v111_v54  ;;  %v71_v54 = vmul.f32 %v228_v35, %v70_v47  ;;  %229 = vrcp.f32 %v89_v55 }
  0x2b   :  { %v157_v3 = vmul.f32 %v156_v1, %v149_v63 }
  0x2c   :  { %v120_v0 = vsel %vm114_vm11, %v119_v59, %v330_v28  ;;  %v72_v59 = vmul.f32 %v71_v54, %v378_v56 }
  0x2d   :  { %v121_v2 = vmul.f32 %v120_v0, %v120_v0  ;;  %v158_v10 = vsel %vm152_vm13, %v157_v3, %v346_v34 }
  0x2e   :  { %v159_v13 = vmul.f32 %v158_v10, %v158_v10  ;;  %v175_v63 = vsub.f32 1.0, %v72_v59 }
  0x2f   :  { %v122_v6 = vmul.f32 0.080537446, %v121_v2 }
  0x30   :  { %v160_v15 = vmul.f32 0.080537446, %v159_v13  ;;  %v230_v34 = vpop.eup %229 }
  0x31   :  { %v207_v11 = vadd.f32 -0.13877685, %v122_v6  ;;  %v91_v3 = vmul.f32 %v230_v34, %v89_v55 }
  0x32   :  { %v210_v24 = vadd.f32 -0.13877685, %v160_v15 }
  0x33   :  { %v124_v14 = vmul.f32 %v207_v11, %v121_v2  ;;  %v92_v56 = vsub.f32 2.0, %v91_v3 }
  0x34   :  { %v162_v33 = vmul.f32 %v210_v24, %v159_v13 }
  0x35   :  { %v125_v23 = vadd.f32 0.19977711, %v124_v14  ;;  %v93_v7 = vmul.f32 %v230_v34, %v92_v56 }
  0x36   :  { %v163_v31 = vadd.f32 0.19977711, %v162_v33 }
  0x37   :  { %v126_v29 = vmul.f32 %v125_v23, %v121_v2 }
  0x38   :  { %v164_v37 = vmul.f32 %v163_v31, %v159_v13 }
  0x39   :  { %v208_v26 = vadd.f32 -0.3333295, %v126_v29 }
  0x3a   :  { %v211_v42 = vadd.f32 -0.3333295, %v164_v37 }
  0x3b   :  { %v128_v30 = vmul.f32 %v208_v26, %v121_v2  ;;  %v73_v2 = vsub.f32 %v304_v12, %v308_v17 }
  0x3c   :  { %v166_v46 = vmul.f32 %v211_v42, %v159_v13 }
  0x3d   :  { %v129_v41 = vmul.f32 %v128_v30, %v120_v0  ;;  %v75_v4 = vmul.f32 %v73_v2, %v73_v2 }
  0x3e   :  { %v167_v50 = vmul.f32 %v166_v46, %v158_v10 }
  0x3f   :  { %v130_v44 = vadd.f32 %v129_v41, %v120_v0  ;;  %v77_v6 = vadd.f32 %v76_v5, %v75_v4 }
  0x40   :  { %v168_v53 = vadd.f32 %v167_v50, %v158_v10 }
  0x41   :  { %v131_v49 = vadd.f32 %v130_v44, %v109_v43  ;;  %v94_v10 = vmul.f32 %v93_v7, %v77_v6 }
  0x42   :  { %v169_v28 = vadd.f32 %v168_v53, %v147_v51 }
  0x43   :  { %v132_v52 = vsub.f32 0.0, %v131_v49  ;;  %v95_v14 = vsub.f32 %v72_v59, %v94_v10 }
  0x44   :  { %v170_v58 = vsub.f32 0.0, %v169_v28 }
  0x45   :  { %v133_v57 = vsel %vm102_vm14, %v132_v52, %v131_v49 }
  0x46   :  { %v171_v60 = vsel %vm140_vm15, %v170_v58, %v169_v28 }
  0x47   :  { %v172_v61 = vsub.f32 %v133_v57, %v171_v60 }
  0x49   :  { %v173_v62 = vmul.f32 %v172_v61, %v172_v61 }
  0x4b   :  { %v174_v0 = vmul.f32 0.40528473, %v173_v62 }
  0x4d   :  { %v176_v1 = vadd.f32 %v175_v63, %v174_v0 }
  0x4f   :  { %v177_v32 = vmax.f32 %v176_v1, 1e-06 }
  0x51   :  { %231 = vrcp.f32 %v177_v32 }
  0x57   :  { %v232_v8 = vpop.eup %231 }
  0x58   :  { %v179_v9 = vmul.f32 %v232_v8, %v177_v32 }
  0x5a   :  { %v180_v11 = vsub.f32 2.0, %v179_v9 }
  0x5c   :  { %v181_v13 = vmul.f32 %v232_v8, %v180_v11 }
  0x5e   :  { %v182_v15 = vmul.f32 %v181_v13, %v174_v0 }
  0x60   :  { %v183_v18 = vmul.f32 %v182_v15, %v174_v0 }
  0x62   :  { %v184_v12 = vsub.f32 %v95_v14, %v183_v18 }
  0x64   :  { %v212_v16 = vclamps-f32 %v184_v12, 1.0 }
  0x66   :  { %v187_v17 = vsub.f32 1.0, %v212_v16 }
  0x68   :  { %188 = vst [vmem:[#allocation5] sm:$0xff] %v187_v17 }
  0x69   :  { %199 = dma.vmem_to_hbm [thread:$0]  %s195_s13, 128, %s197_s16, [#allocation4]  }
  0x6a   :  { %283 = dma.done.wait [#allocation4], 128  }
  0x6b   :  { %284 = vsyncadd [#allocation4], 4294967168 }
  0x6c   :  { %204 = vsyncpa [#allocation3], 1 }
  0x6d   :  { %205 = vsyncpa [#allocation4], 1 }

</bundles_post_ra>
